<compile_context>
chip_gen: v7x
topology: tpu7x:2x2x1
jax: 0.10.0
libtpu: 0.0.40
codegen_flags: <defaults>
</compile_context>

<pallas_src>
import numpy as np
import jax
import jax.numpy as jnp
from jax.experimental import pallas as pl
from jax.experimental.pallas import tpu as pltpu

JITTER = 1e-5


# ----------------------------------------------------------------------------------------------
# Pallas kernel: computes (grad_x H(x)) @ J.T for one lane-dense tile of columns of x^T.
# All operands arrive pre-transposed / pre-scaled / pre-padded from the wrapper.
# ----------------------------------------------------------------------------------------------
def _ham_dsvgp_kernel(x_ref, om_sd_ref, phase_ref, w_ref, omj_ref,
                      zil2_ref, z2h_ref, nuv_ref, zjt_ref, b_ref, nhil2_ref,
                      out_ref):
    xT = x_ref[...]                                                             # (Dp, TN)

    # ---- gradient of the RFF prior term (J folded into omj = J @ omega) -----------------------
    #   (grad_rff @ J.T)^T = (J @ omega) @ [ sin(omega^T x + phi) * (-coef * w) ]
    xo = jnp.dot(om_sd_ref[...], xT, preferred_element_type=jnp.float32)        # (S, TN)
    sw = jnp.sin(xo + phase_ref[...]) * w_ref[...]                              # (S, TN)
    g_rff = jnp.dot(omj_ref[...], sw, preferred_element_type=jnp.float32)       # (Dp, TN)

    # ---- gradient of the pathwise-update term (J folded into zjt, b) --------------------------
    #   a[m,n] = variance * nu_m * exp(-0.5*|x_n - z_m|^2_ell)
    x2h = jnp.sum(xT * xT * nhil2_ref[...], axis=0, keepdims=True)              # (1, TN)
    cross = jnp.dot(zil2_ref[...], xT, preferred_element_type=jnp.float32)      # (M, TN)
    a = jnp.exp(cross + x2h + z2h_ref[...]) * nuv_ref[...]                      # (M, TN)
    suma = jnp.sum(a, axis=0, keepdims=True)                                    # (1, TN)
    g_upd = (jnp.dot(zjt_ref[...], a, preferred_element_type=jnp.float32)
             - jnp.dot(b_ref[...], xT, preferred_element_type=jnp.float32) * suma)  # (Dp, TN)

    out_ref[...] = g_rff + g_upd                                                # (Dp, TN)


# ----------------------------------------------------------------------------------------------
# Wrapper: x-independent precompute (hoisted), lane-dense transposed layout, padding, pallas_call.
# ----------------------------------------------------------------------------------------------
def hamiltonian_dsvgp_forward(t, x, Z, rff_omega, rff_phase, rff_weights, nu,
                              lengthscales, variance, J, *, tile_n=512):
    del t  # time-invariant ODE, matches torch module (t unused)
    N, D = x.shape
    M = Z.shape[0]
    S = rff_omega.shape[1]

    f32 = jnp.float32
    var = float(variance)
    coef = float(np.sqrt(var / S))
    invl2 = (1.0 / (jnp.asarray(lengthscales, f32) ** 2))                        # (D,)

    Zf = jnp.asarray(Z, f32)
    Jf = jnp.asarray(J, f32)
    omega = jnp.asarray(rff_omega, f32)                                          # (D, S)

    # ---- padding sizes: sublane (8) on the D axis, lane tile (>=128) on the N axis ------------
    SUBL, LANE = 8, 128

    def _round_up(a, b):
        return ((a + b - 1) // b) * b

    Dp = _round_up(D, SUBL)                                                      # padded D (>=8)
    tile = max(LANE, min(_round_up(int(tile_n), LANE), _round_up(N, LANE)))
    n_pad = _round_up(N, tile)

    def _padD_rows(a):   # pad rows D -> Dp with zeros
        return jnp.pad(a, ((0, Dp - D), (0, 0)))

    def _padD_cols(a):   # pad cols D -> Dp with zeros
        return jnp.pad(a, ((0, 0), (0, Dp - D)))

    # ---- x-independent precompute (done once, outside the grid) ------------------------------
    om_sd = _padD_cols(omega.T)                                                  # (S, Dp)
    phase_col = jnp.asarray(rff_phase, f32).reshape(S, 1)                        # (S, 1)
    w_col = (-coef) * jnp.asarray(rff_weights, f32).reshape(S, 1)                # (S, 1)
    omj = _padD_rows(Jf @ omega)                                                 # (Dp, S) = J @ omega
    zil2 = _padD_cols(Zf * invl2[None, :])                                       # (M, Dp) = Z / ell^2
    z2h = -0.5 * jnp.sum(Zf * Zf * invl2[None, :], axis=1, keepdims=True)        # (M, 1)
    nuv = var * jnp.asarray(nu, f32).reshape(M, 1)                               # (M, 1)
    B = Jf * invl2[None, :]                                                      # (D, D) = J @ diag(1/ell^2)
    zjt = _padD_rows(B @ Zf.T)                                                   # (Dp, M)
    Bp = _padD_cols(_padD_rows(B))                                               # (Dp, Dp)
    nhil2 = _padD_rows((-0.5 * invl2).reshape(D, 1))                             # (Dp, 1)

    # ---- lane-dense layout: batch on the 128-lane axis, D padded to full sublanes -------------
    xT = jnp.pad(jnp.asarray(x, f32).T, ((0, Dp - D), (0, n_pad - N)))           # (Dp, n_pad)

    outT = pl.pallas_call(
        _ham_dsvgp_kernel,
        out_shape=jax.ShapeDtypeStruct((Dp, n_pad), f32),
        grid_spec=pltpu.PrefetchScalarGridSpec(
            num_scalar_prefetch=0,
            grid=(n_pad // tile,),
            in_specs=[
                pl.BlockSpec((Dp, tile), lambda i: (0, i)),   # x^T tile (lane-dense, full vregs)
                pl.BlockSpec((S, Dp),    lambda i: (0, 0)),   # omega^T            (constant)
                pl.BlockSpec((S, 1),     lambda i: (0, 0)),   # rff phase          (constant)
                pl.BlockSpec((S, 1),     lambda i: (0, 0)),   # -coef * rff weights(constant)
                pl.BlockSpec((Dp, S),    lambda i: (0, 0)),   # J @ omega          (constant)
                pl.BlockSpec((M, Dp),    lambda i: (0, 0)),   # Z / ell^2          (constant)
                pl.BlockSpec((M, 1),     lambda i: (0, 0)),   # -0.5*|z/ell|^2     (constant)
                pl.BlockSpec((M, 1),     lambda i: (0, 0)),   # variance * nu      (constant)
                pl.BlockSpec((Dp, M),    lambda i: (0, 0)),   # J @ diag(1/ell^2) @ Z^T (constant)
                pl.BlockSpec((Dp, Dp),   lambda i: (0, 0)),   # J @ diag(1/ell^2)  (constant)
                pl.BlockSpec((Dp, 1),    lambda i: (0, 0)),   # -0.5 / ell^2       (constant)
            ],
            out_specs=pl.BlockSpec((Dp, tile), lambda i: (0, i)),
        ),
        compiler_params=pltpu.CompilerParams(
            dimension_semantics=("parallel",),
        ),
    )(xT, om_sd, phase_col, w_col, omj, zil2, z2h, nuv, zjt, Bp, nhil2)

    return outT[:D, :N].T                                                        # (N, D)


# ----------------------------------------------------------------------------------------------
# Parameter construction (deterministic, mirrors DSVGP_Layer.__init__ + build_cache) -- plain JAX.
# ----------------------------------------------------------------------------------------------
def rbf_K(A, B, lengthscales, variance):
    As = A / lengthscales
    Bs = B / lengthscales
    d2 = (jnp.sum(As * As, 1)[:, None] + jnp.sum(Bs * Bs, 1)[None, :] - 2.0 * As @ Bs.T)
    return variance * jnp.exp(-0.5 * d2)


def build_params(key, D_in, M, S):
    assert D_in % 2 == 0
    keys = jax.random.split(key, 6)

    variance = 1.0
    lengthscales = jnp.ones((D_in,), jnp.float32)

    Z       = jax.random.normal(keys[0], (M, D_in), jnp.float32)     # inducing_loc
    Um      = jnp.zeros((M, 1), jnp.float32)                         # inducing mean
    Us_sqrt = jnp.eye(M, dtype=jnp.float32)[None] * 0.1              # (1, M, M)

    rff_weights = jax.random.normal(keys[1], (S, 1), jnp.float32)
    rff_omega   = jax.random.normal(keys[2], (D_in, S), jnp.float32) / lengthscales[:, None]
    rff_phase   = jax.random.uniform(keys[3], (1, S), jnp.float32) * 2.0 * np.pi

    # sample_inducing()
    eps = jax.random.normal(keys[4], (M, 1), jnp.float32)
    ZS = jnp.einsum('dnm,md->nd', Us_sqrt, eps)
    u_sample = ZS + Um                                               # (M, 1)

    # build_cache(): whitened pathwise-update weights nu  (one-time setup, done in plain JAX)
    Ku = rbf_K(Z, Z, lengthscales, variance)
    Lu = jnp.linalg.cholesky(Ku + jnp.eye(M, dtype=jnp.float32) * JITTER)
    xo = Z @ rff_omega
    phi = jnp.cos(xo + rff_phase) * jnp.sqrt(variance / S)
    u_prior = phi @ rff_weights                                      # (M, 1)
    nu = jax.scipy.linalg.solve_triangular(Lu, u_prior, lower=True)
    nu = jax.scipy.linalg.solve_triangular(Lu.T, u_sample - nu, lower=False)  # (M, 1)

    # build_J(D_in): symplectic matrix [[0, I], [-I, 0]]
    n = D_in // 2
    J = jnp.block([[jnp.zeros((n, n)), jnp.eye(n)],
                   [-jnp.eye(n), jnp.zeros((n, n))]]).astype(jnp.float32)

    x_key = keys[5]
    return dict(Z=Z, rff_weights=rff_weights, rff_omega=rff_omega, rff_phase=rff_phase,
                nu=nu, lengthscales=lengthscales, variance=variance, J=J), x_key


# ----------------------------------------------------------------------------------------------
# Pure-JAX reference (uses jax.grad, mirrors the torch forward exactly) for verification.
# ----------------------------------------------------------------------------------------------
def reference_forward(x, p):
    def hamiltonian(xi):
        xo = xi @ p['rff_omega']
        phi = jnp.cos(xo + p['rff_phase']) * jnp.sqrt(p['variance'] / p['rff_omega'].shape[1])
        f_prior = phi @ p['rff_weights']                                    # (N, 1)
        Kuf = rbf_K(p['Z'], xi, p['lengthscales'], p['variance'])           # (M, N)
        f_update = jnp.einsum('md,mn->nd', p['nu'], Kuf)                    # (N, 1)
        return (f_prior + f_update)[:, 0]
    dHdx = jax.grad(lambda xi: hamiltonian(xi).sum())(x)
    return dHdx @ p['J'].T


if __name__ == "__main__":
    D_in, M, S, N = 4, 16, 32, 256

    params, x_key = build_params(jax.random.PRNGKey(0), D_in, M, S)
    x = jax.random.normal(x_key, (N, D_in), jnp.float32)

    # tile_n=128 -> 2 grid steps at N=256 (keeps both v7x TensorCores busy); default is 512.
    out = hamiltonian_dsvgp_forward(None, x, params['Z'], params['rff_omega'],
                                    params['rff_phase'], params['rff_weights'],
                                    params['nu'], params['lengthscales'],
                                    params['variance'], params['J'], tile_n=128)
    out = jax.block_until_ready(out)

    ref = jax.block_until_ready(reference_forward(x, params))
    np.testing.assert_allclose(np.asarray(out), np.asarray(ref), rtol=1e-3, atol=1e-3)

    print("KERNEL_OK")
</pallas_src>

<mosaic_0001>
module attributes {stable_mosaic.version = 11 : i64} {
  func.func @_ham_dsvgp_kernel(%arg0: i32, %arg1: memref<8x128xf32, #tpu.memory_space<vmem>>, %arg2: memref<32x8xf32, #tpu.memory_space<vmem>>, %arg3: memref<32x1xf32, #tpu.memory_space<vmem>>, %arg4: memref<32x1xf32, #tpu.memory_space<vmem>>, %arg5: memref<8x32xf32, #tpu.memory_space<vmem>>, %arg6: memref<16x8xf32, #tpu.memory_space<vmem>>, %arg7: memref<16x1xf32, #tpu.memory_space<vmem>>, %arg8: memref<16x1xf32, #tpu.memory_space<vmem>>, %arg9: memref<8x16xf32, #tpu.memory_space<vmem>>, %arg10: memref<8x8xf32, #tpu.memory_space<vmem>>, %arg11: memref<8x1xf32, #tpu.memory_space<vmem>>, %arg12: memref<8x128xf32, #tpu.memory_space<vmem>>) attributes {dimension_semantics = [#tpu.dimension_semantics<parallel>], iteration_bounds = array<i64: 2>, scalar_prefetch = 0 : i64, scratch_operands = 0 : i64, tpu.core_type = #tpu.core_type<tc>, window_params = [{transform_indices = @transform_0, window_bounds = array<i64: 8, 128>}, {pipeline_mode = #tpu.pipeline_mode<synchronous>, transform_indices = @transform_1, window_bounds = array<i64: 32, 8>}, {pipeline_mode = #tpu.pipeline_mode<synchronous>, transform_indices = @transform_2, window_bounds = array<i64: 32, 1>}, {pipeline_mode = #tpu.pipeline_mode<synchronous>, transform_indices = @transform_3, window_bounds = array<i64: 32, 1>}, {pipeline_mode = #tpu.pipeline_mode<synchronous>, transform_indices = @transform_4, window_bounds = array<i64: 8, 32>}, {pipeline_mode = #tpu.pipeline_mode<synchronous>, transform_indices = @transform_5, window_bounds = array<i64: 16, 8>}, {pipeline_mode = #tpu.pipeline_mode<synchronous>, transform_indices = @transform_6, window_bounds = array<i64: 16, 1>}, {pipeline_mode = #tpu.pipeline_mode<synchronous>, transform_indices = @transform_7, window_bounds = array<i64: 16, 1>}, {pipeline_mode = #tpu.pipeline_mode<synchronous>, transform_indices = @transform_8, window_bounds = array<i64: 8, 16>}, {pipeline_mode = #tpu.pipeline_mode<synchronous>, transform_indices = @transform_9, window_bounds = array<i64: 8, 8>}, {pipeline_mode = #tpu.pipeline_mode<synchronous>, transform_indices = @transform_10, window_bounds = array<i64: 8, 1>}, {transform_indices = @transform_11, window_bounds = array<i64: 8, 128>}]} {
    %c0 = arith.constant 0 : index
    %c0_0 = arith.constant 0 : index
    %0 = vector.load %arg1[%c0, %c0_0] : memref<8x128xf32, #tpu.memory_space<vmem>>, vector<8x128xf32>
    %c0_1 = arith.constant 0 : index
    %c0_2 = arith.constant 0 : index
    %1 = vector.load %arg2[%c0_1, %c0_2] : memref<32x8xf32, #tpu.memory_space<vmem>>, vector<32x8xf32>
    %cst = arith.constant dense<0.000000e+00> : vector<32x128xf32>
    %2 = tpu.matmul %1, %0, %cst {dimension_numbers = #tpu.dot_dimension_numbers<[1], [0], [0], [1], [0, 0, 1, 1], [], []>} : vector<32x8xf32>, vector<8x128xf32>, vector<32x128xf32> -> vector<32x128xf32>
    %c0_3 = arith.constant 0 : index
    %c0_4 = arith.constant 0 : index
    %3 = vector.load %arg3[%c0_3, %c0_4] : memref<32x1xf32, #tpu.memory_space<vmem>>, vector<32x1xf32>
    %4 = vector.broadcast %3 : vector<32x1xf32> to vector<32x128xf32>
    %5 = arith.addf %2, %4 : vector<32x128xf32>
    %6 = math.sin %5 : vector<32x128xf32>
    %c0_5 = arith.constant 0 : index
    %c0_6 = arith.constant 0 : index
    %7 = vector.load %arg4[%c0_5, %c0_6] : memref<32x1xf32, #tpu.memory_space<vmem>>, vector<32x1xf32>
    %8 = vector.broadcast %7 : vector<32x1xf32> to vector<32x128xf32>
    %9 = arith.mulf %6, %8 : vector<32x128xf32>
    %c0_7 = arith.constant 0 : index
    %c0_8 = arith.constant 0 : index
    %10 = vector.load %arg5[%c0_7, %c0_8] : memref<8x32xf32, #tpu.memory_space<vmem>>, vector<8x32xf32>
    %cst_9 = arith.constant dense<0.000000e+00> : vector<8x128xf32>
    %11 = tpu.matmul %10, %9, %cst_9 {dimension_numbers = #tpu.dot_dimension_numbers<[1], [0], [0], [1], [0, 0, 1, 1], [], []>} : vector<8x32xf32>, vector<32x128xf32>, vector<8x128xf32> -> vector<8x128xf32>
    %12 = arith.mulf %0, %0 : vector<8x128xf32>
    %c0_10 = arith.constant 0 : index
    %c0_11 = arith.constant 0 : index
    %13 = vector.load %arg11[%c0_10, %c0_11] : memref<8x1xf32, #tpu.memory_space<vmem>>, vector<8x1xf32>
    %14 = vector.broadcast %13 : vector<8x1xf32> to vector<8x128xf32>
    %15 = arith.mulf %12, %14 : vector<8x128xf32>
    %cst_12 = arith.constant dense<0.000000e+00> : vector<128xf32>
    %16 = vector.multi_reduction <add>, %15, %cst_12 [0] : vector<8x128xf32> to vector<128xf32>
    %17 = vector.shape_cast %16 : vector<128xf32> to vector<1x128xf32>
    %c0_13 = arith.constant 0 : index
    %c0_14 = arith.constant 0 : index
    %18 = vector.load %arg6[%c0_13, %c0_14] : memref<16x8xf32, #tpu.memory_space<vmem>>, vector<16x8xf32>
    %cst_15 = arith.constant dense<0.000000e+00> : vector<16x128xf32>
    %19 = tpu.matmul %18, %0, %cst_15 {dimension_numbers = #tpu.dot_dimension_numbers<[1], [0], [0], [1], [0, 0, 1, 1], [], []>} : vector<16x8xf32>, vector<8x128xf32>, vector<16x128xf32> -> vector<16x128xf32>
    %20 = vector.broadcast %17 : vector<1x128xf32> to vector<16x128xf32>
    %21 = arith.addf %19, %20 : vector<16x128xf32>
    %c0_16 = arith.constant 0 : index
    %c0_17 = arith.constant 0 : index
    %22 = vector.load %arg7[%c0_16, %c0_17] : memref<16x1xf32, #tpu.memory_space<vmem>>, vector<16x1xf32>
    %23 = vector.broadcast %22 : vector<16x1xf32> to vector<16x128xf32>
    %24 = arith.addf %21, %23 : vector<16x128xf32>
    %25 = math.exp %24 : vector<16x128xf32>
    %c0_18 = arith.constant 0 : index
    %c0_19 = arith.constant 0 : index
    %26 = vector.load %arg8[%c0_18, %c0_19] : memref<16x1xf32, #tpu.memory_space<vmem>>, vector<16x1xf32>
    %27 = vector.broadcast %26 : vector<16x1xf32> to vector<16x128xf32>
    %28 = arith.mulf %25, %27 : vector<16x128xf32>
    %cst_20 = arith.constant dense<0.000000e+00> : vector<128xf32>
    %29 = vector.multi_reduction <add>, %28, %cst_20 [0] : vector<16x128xf32> to vector<128xf32>
    %30 = vector.shape_cast %29 : vector<128xf32> to vector<1x128xf32>
    %c0_21 = arith.constant 0 : index
    %c0_22 = arith.constant 0 : index
    %31 = vector.load %arg9[%c0_21, %c0_22] : memref<8x16xf32, #tpu.memory_space<vmem>>, vector<8x16xf32>
    %cst_23 = arith.constant dense<0.000000e+00> : vector<8x128xf32>
    %32 = tpu.matmul %31, %28, %cst_23 {dimension_numbers = #tpu.dot_dimension_numbers<[1], [0], [0], [1], [0, 0, 1, 1], [], []>} : vector<8x16xf32>, vector<16x128xf32>, vector<8x128xf32> -> vector<8x128xf32>
    %c0_24 = arith.constant 0 : index
    %c0_25 = arith.constant 0 : index
    %33 = vector.load %arg10[%c0_24, %c0_25] : memref<8x8xf32, #tpu.memory_space<vmem>>, vector<8x8xf32>
    %cst_26 = arith.constant dense<0.000000e+00> : vector<8x128xf32>
    %34 = tpu.matmul %33, %0, %cst_26 {dimension_numbers = #tpu.dot_dimension_numbers<[1], [0], [0], [1], [0, 0, 1, 1], [], []>} : vector<8x8xf32>, vector<8x128xf32>, vector<8x128xf32> -> vector<8x128xf32>
    %35 = vector.broadcast %30 : vector<1x128xf32> to vector<8x128xf32>
    %36 = arith.mulf %34, %35 : vector<8x128xf32>
    %37 = arith.subf %32, %36 : vector<8x128xf32>
    %38 = arith.addf %11, %37 : vector<8x128xf32>
    %c0_27 = arith.constant 0 : index
    %c0_28 = arith.constant 0 : index
    %39 = vector.load %arg12[%c0_27, %c0_28] : memref<8x128xf32, #tpu.memory_space<vmem>>, vector<8x128xf32>
    tpu.vector_store %arg12[%c0_27, %c0_28], %38 {strides = array<i32>} : memref<8x128xf32, #tpu.memory_space<vmem>>, vector<8x128xf32>,
    return
  }
  func.func @transform_0(%arg0: i32) -> (i32, i32) {
    %c0_i32 = arith.constant 0 : i32
    %c0_i32_0 = arith.constant 0 : i32
    return %c0_i32, %arg0 : i32, i32
  }
  func.func @transform_1(%arg0: i32) -> (i32, i32) {
    %c0_i32 = arith.constant 0 : i32
    %c0_i32_0 = arith.constant 0 : i32
    %c0_i32_1 = arith.constant 0 : i32
    return %c0_i32, %c0_i32_0 : i32, i32
  }
  func.func @transform_2(%arg0: i32) -> (i32, i32) {
    %c0_i32 = arith.constant 0 : i32
    %c0_i32_0 = arith.constant 0 : i32
    %c0_i32_1 = arith.constant 0 : i32
    return %c0_i32, %c0_i32_0 : i32, i32
  }
  func.func @transform_3(%arg0: i32) -> (i32, i32) {
    %c0_i32 = arith.constant 0 : i32
    %c0_i32_0 = arith.constant 0 : i32
    %c0_i32_1 = arith.constant 0 : i32
    return %c0_i32, %c0_i32_0 : i32, i32
  }
  func.func @transform_4(%arg0: i32) -> (i32, i32) {
    %c0_i32 = arith.constant 0 : i32
    %c0_i32_0 = arith.constant 0 : i32
    %c0_i32_1 = arith.constant 0 : i32
    return %c0_i32, %c0_i32_0 : i32, i32
  }
  func.func @transform_5(%arg0: i32) -> (i32, i32) {
    %c0_i32 = arith.constant 0 : i32
    %c0_i32_0 = arith.constant 0 : i32
    %c0_i32_1 = arith.constant 0 : i32
    return %c0_i32, %c0_i32_0 : i32, i32
  }
  func.func @transform_6(%arg0: i32) -> (i32, i32) {
    %c0_i32 = arith.constant 0 : i32
    %c0_i32_0 = arith.constant 0 : i32
    %c0_i32_1 = arith.constant 0 : i32
    return %c0_i32, %c0_i32_0 : i32, i32
  }
  func.func @transform_7(%arg0: i32) -> (i32, i32) {
    %c0_i32 = arith.constant 0 : i32
    %c0_i32_0 = arith.constant 0 : i32
    %c0_i32_1 = arith.constant 0 : i32
    return %c0_i32, %c0_i32_0 : i32, i32
  }
  func.func @transform_8(%arg0: i32) -> (i32, i32) {
    %c0_i32 = arith.constant 0 : i32
    %c0_i32_0 = arith.constant 0 : i32
    %c0_i32_1 = arith.constant 0 : i32
    return %c0_i32, %c0_i32_0 : i32, i32
  }
  func.func @transform_9(%arg0: i32) -> (i32, i32) {
    %c0_i32 = arith.constant 0 : i32
    %c0_i32_0 = arith.constant 0 : i32
    %c0_i32_1 = arith.constant 0 : i32
    return %c0_i32, %c0_i32_0 : i32, i32
  }
  func.func @transform_10(%arg0: i32) -> (i32, i32) {
    %c0_i32 = arith.constant 0 : i32
    %c0_i32_0 = arith.constant 0 : i32
    %c0_i32_1 = arith.constant 0 : i32
    return %c0_i32, %c0_i32_0 : i32, i32
  }
  func.func @transform_11(%arg0: i32) -> (i32, i32) {
    %c0_i32 = arith.constant 0 : i32
    %c0_i32_0 = arith.constant 0 : i32
    return %c0_i32, %arg0 : i32, i32
  }
}

</mosaic_0001>

<bundles_post_ra>
// kernel: tpu_custom_call.1
= control target key start
LH: loop header
LB: loop body
LE: loop exit
PB: predicated region body
PF: predicated region fallthrough
CT: control target
= control target key end

     0   :  { %16 = vsyncpa [#allocation3], 0  ;;  %s2220_s0 = inlined_call_operand.vmem [shape: f32[8,256], index: 0, kind: input, shape index: {}]   ;;  %s2221_s1 = inlined_call_operand.vmem [shape: f32[32,8], index: 1, kind: input, shape index: {}]   ;;  %s2222_s2 = inlined_call_operand.vmem [shape: f32[32,1], index: 2, kind: input, shape index: {}]   ;;  %s2223_s3 = inlined_call_operand.vmem [shape: f32[32,1], index: 3, kind: input, shape index: {}]   ;;  %s2224_s4 = inlined_call_operand.vmem [shape: f32[8,32], index: 4, kind: input, shape index: {}]   ;;  %s2225_s5 = inlined_call_operand.vmem [shape: f32[16,8], index: 5, kind: input, shape index: {}]   ;;  %s2226_s6 = inlined_call_operand.vmem [shape: f32[16,1], index: 6, kind: input, shape index: {}]   ;;  %s2227_s7 = inlined_call_operand.vmem [shape: f32[16,1], index: 7, kind: input, shape index: {}]   ;;  %s2228_s8 = inlined_call_operand.vmem [shape: f32[8,16], index: 8, kind: input, shape index: {}]   ;;  %s2229_s9 = inlined_call_operand.vmem [shape: f32[8,8], index: 9, kind: input, shape index: {}]   ;;  %s2230_s10 = inlined_call_operand.vmem [shape: f32[8,1], index: 10, kind: input, shape index: {}]   ;;  %s2231_s11 = inlined_call_operand.hbm [shape: f32[8,256], index: 11, kind: output, shape index: {}]  }
   0x1   :  { %18 = vsyncpa [#allocation3 + $0x1], 0  ;;  %s1709_s17 = smov 0   ;;  %s1711_s18 = smov 0  }
   0x2   :  { %s1713_s19 = smov 0   ;;  %s1715_s20 = smov 0  }
   0x3 LB: > { %2233 = sst [smem:[#allocation5_spill]] %s1632_s19  ;;  %s1730_s21 = sadd.s32 4294967295, %s1636_s20   ;;  %s1636_s20 = sphi %s1715_s20, %s2248_s20   ;;  %s1632_s19 = sphi %s1713_s19, %s2247_s19   ;;  %s1628_s18 = sphi %s1711_s18, %s2246_s18   ;;  %s1624_s17 = sphi %s1709_s17, %s2245_s17  }
   0x4   : > { %s1389_s22 = sadd.s32 4294967294, %s1636_s20   ;;  %s1734_s23 = sadd.s32 1, %s1636_s20  }
   0x5   : > { %s267_s24 = sadd.s32 1, %s1632_s19  ;;  %s264_s25 = ssub.s32 %s1636_s20, %s1734_s23 }
   0x6   : > { %p277_p0 = scmp.ne.s32.totalorder %s1632_s19, %s1628_s18  ;;  %p265_p1 = scmp.eq.s32.totalorder %s264_s25, 0 }
   0x7   : > { %p278_p2 = scmp.eq.s32.totalorder %s1730_s21, 1  ;;  %p283_p3 = scmp.ne.s32.totalorder %s1628_s18, %s1624_s17 }
   0x8   : > { %p284_p4 = scmp.eq.s32.totalorder %s1389_s22, 1  ;;  %p1392_p7 = scmp.ge.s32.totalorder %s1636_s20, 1 }
   0x9   : > { %s1745_s26 = scalar_select %p265_p1, %s1632_s19, %s267_s24  }
   0xa   : > { %p1747_p5 = por %p278_p2, %p277_p0  ;;  %p1751_p6 = por %p284_p4, %p283_p3 }
   0xb   : > { %2234 = sst [smem:[#allocation6_spill]] %s1745_s26  ;;  %p339_p8 = scmp.lt.s32.totalorder %s1636_s20, 3 }
   0xd   : > { %p340_p9 = pnand %p1392_p7, %p339_p8 }
   0xe   : > { %p378_p10 = scmp.lt.s32.totalorder (!%p340_p9), %s1730_s21, 1  ;;  %v383_v0 = vld [vmem:[%s2221_s1] sm:$0xff] (!%p340_p9)  ;;  %vm411_vm0 = vcmask (!%p340_p9), 64512   ;;  %v1638_v2 = vmov (!%p340_p9), 0   ;;  %v389_v4 = vld [vmem:[%s2222_s2 + $0x10] sm:$0xff] (!%p340_p9)  ;;  %v384_v6 = vld [vmem:[%s2221_s1 + $0x8] sm:$0xff] (!%p340_p9) }
   0xf   : > { %343 = sbr.rel (%p340_p9) target bundleno = 615 (0x267), region = 64  ;;  %v968_v1 = vld [vmem:[%s2225_s5] sm:$0xff] (!%p340_p9)  ;;  %1444 = vmatprep.mubr.msk.f32.mxu0 (!%p340_p9), %vm411_vm0, %v383_v0  ;;  %1552 = vset.pattern.permute.xlu0 (!%p340_p9), %v1638_v2  ;;  %v969_v7 = vld [vmem:[%s2225_s5 + $0x8] sm:$0xff] (!%p340_p9)  ;;  %v385_v8 = vld [vmem:[%s2221_s1 + $0x10] sm:$0xff] (!%p340_p9)  ;;  %v1639_v12 = vmov (!%p340_p9), 0.0   ;;  %vm1640_vm1 = vmmov (!%p340_p9), 0  }
  0x10   : > { %1452 = vmatprep.mubr.msk.f32.mxu1 (!%p340_p9), %vm411_vm0, %v968_v1  ;;  %v387_v3 = vld [vmem:[%s2222_s2] sm:$0xff] (!%p340_p9)  ;;  %1553 = vset.pattern.permute.xlu1 (!%p340_p9), %v1638_v2  ;;  %v388_v9 = vld [vmem:[%s2222_s2 + $0x8] sm:$0xff] (!%p340_p9)  ;;  %v390_v10 = vld [vmem:[%s2222_s2 + $0x18] sm:$0xff] (!%p340_p9)  ;;  %v1641_v23 = vmov (!%p340_p9), 0.0|0.0   ;;  %s375_s30 = sand.u32 (!%p340_p9), 1, %s1628_s18   ;;  %s1421_s13 = sshll.u32 (!%p340_p9), %s1730_s21, 7 }
  0x11   : > { %393 = vperm.xlu0 (!%p340_p9), %1552, %v387_v3   ;;  %403 = vperm.xlu1 (!%p340_p9), %1553, %v389_v4   ;;  %v386_v11 = vld [vmem:[%s2221_s1 + $0x18] sm:$0xff] (!%p340_p9)  ;;  %v955_v13 = vld [vmem:[%s2230_s10] sm:$0xff] (!%p340_p9)  ;;  %v1052_v16 = vld [vmem:[%s2226_s6 + $0x8] sm:$0xff] (!%p340_p9)  ;;  %s2178_s24 = scalar_lea.hbm (!%p340_p9), %s2231_s11, %s1421_s13  ;;  %s1317_s26 = scalar_lea.sflag (!%p340_p9), [#allocation3], %s375_s30 }
  0x12   : > { %v1051_v14 = vld [vmem:[%s2226_s6] sm:$0xff] (!%p340_p9)  ;;  %v1070_v18 = vld [vmem:[%s2227_s7 + $0x8] sm:$0xff] (!%p340_p9)  ;;  %v927_v21 = vld [vmem:[%s2223_s3 + $0x10] sm:$0xff] (!%p340_p9) }
  0x13   : > { %v1165_v15 = vld [vmem:[%s2229_s9] sm:$0xff] (!%p340_p9)  ;;  %v926_v20 = vld [vmem:[%s2223_s3 + $0x8] sm:$0xff] (!%p340_p9)  ;;  %v928_v22 = vld [vmem:[%s2223_s3 + $0x18] sm:$0xff] (!%p340_p9) }
  0x14   : > { %v1069_v17 = vld [vmem:[%s2227_s7] sm:$0xff] (!%p340_p9) }
  0x15   : > { %398 = vperm.xlu0 (!%p340_p9), %1552, %v388_v9   ;;  %408 = vperm.xlu1 (!%p340_p9), %1553, %v390_v10   ;;  %v925_v19 = vld [vmem:[%s2223_s3] sm:$0xff] (!%p340_p9) }
  0x16   : > { %s379_s14 = scalar_select %p378_p10, %s1730_s21, 1 }
  0x17   : > { %s1648_s21 = smov [#allocation2]  }
  0x18   : > { %s1394_s25 = sshll.u32 %s379_s14, 3  ;;  %s1578_s19 = sshll.u32 %s1648_s21, 4  ;;  %s1579_s19 = int_to_ptr.vmem [resolvable:$false] %s1578_s19 }
  0x19   : > { %s381_s12 = scalar_lea.vmem %s2220_s0, %s1394_s25  ;;  %958 = vperm.xlu0 %1552, %v955_v13   ;;  %1055 = vperm.xlu1 %1553, %v1051_v14   ;;  %s1580_s29 = scalar_lea.vmem %s1579_s19, 256 }
  0x1a   : > { %v382_v5 = vld [vmem:[%s381_s12] sm:$0xff]  ;;  %s1393_s12 = sshll.u32 %s375_s30, 3 }
  0x1b   : > { %1442 = vmatprep.subr.mxu0 %v382_v5  ;;  %1450 = vmatprep.subr.mxu1 %v382_v5  ;;  %v954_v26 = vmul.f32 %v382_v5, %v382_v5  ;;  %s377_s15 = scalar_lea.vmem [#allocation2], %s1393_s12 }
  0x1c   : > { %1443 = vmatpush3.msra.mxu0 %v382_v5  ;;  %1451 = vmatpush3.msra.mxu1 %v382_v5  ;;  %s1330_s16 = sshll.u32 %s377_s15, 4  ;;  %s2180_s16 = int_to_ptr.vmem [resolvable:$true] %s1330_s16 }
  0x1d   : > { %1445 = vmatmul.mubr.msk.f32.vlgmr.msra.gmra.mrb[0].mxu0 %vm411_vm0, %v384_v6  ;;  %1453 = vmatmul.mubr.msk.f32.vlgmr.msra.gmra.mrb[0].mxu1 %vm411_vm0, %v969_v7  ;;  %s1574_s25 = scalar_lea.vmem %s2180_s16, 128  ;;  %p1581_p0 = scmp.lt.s32.totalorder %s2180_s16, %s1579_s19 }
  0x1e   : > { %1447 = vmatprep.mubr.msk.f32.mxu0 %vm411_vm0, %v385_v8  ;;  %1462 = vmatprep.subr.mxu0 %v1639_v12  ;;  %p1575_p11 = scmp.ne.s32.totalorder %s2180_s16, %s1574_s25  ;;  %p1582_p1 = scmp.lt.s32.totalorder %s1580_s29, %s1574_s25 }
  0x1f   : > { %1463 = vmatpush3.msra.mxu0 %v382_v5  ;;  %1459 = vmatprep.mubr.msk.f32.mxu1 %vm1640_vm1, %v1639_v12 }
  0x20   : > { %1060 = vperm.xlu0 %1552, %v1052_v16   ;;  %1073 = vperm.xlu1 %1553, %v1069_v17   ;;  %p1576_p12 = pnand %p1575_p11, %p1747_p5  ;;  %p1583_p2 = por %p1582_p1, %p1581_p0 }
  0x21   : > { %1448 = vmatmul.mubr.msk.f32.gmra.mrb[2].mxu0 %vm411_vm0, %v386_v11  ;;  %1478 = vmatprep.subr.bf16.mxu1 %v1641_v23 }
  0x22   : > { %1464 = vmatprep.mubr.msk.f32.mxu0 %vm1640_vm1, %v1639_v12  ;;  %p1577_p13 = pneg %p1576_p12 }
  0x24   : > { %1078 = vperm.xlu0 %1552, %v1070_v18   ;;  %931 = vperm.xlu1 %1553, %v925_v19   ;;  %p1584_p3 = pnand %p1583_p2, %p1577_p13 }
  0x25   : > { %1465 = vmatmul.mubr.msk.f32.vlgmr.msra.gmra.mrb[4].mxu0 %vm411_vm0, %v1165_v15 }
  0x28   : > { %936 = vperm.xlu0 %1552, %v926_v20   ;;  %941 = vperm.xlu1 %1553, %v927_v21   ;;  %v1642_v21 = vmov 683565275  }
  0x2c   : > { %946 = vperm.xlu0 %1552, %v928_v22  }
  0x90   : > { %v394_v24 = vpop.permute.xlu0 %393  ;;  %v404_v33 = vpop.permute.xlu1 %403 }
  0x94   : > { %v399_v25 = vpop.permute.xlu0 %398  ;;  %v409_v36 = vpop.permute.xlu1 %408 }
  0x98   : > { %v959_v27 = vpop.permute.xlu0 %958  ;;  %v1056_v48 = vpop.permute.xlu1 %1055 }
  0x99   : > { %v961_v28 = vmul.f32 %v959_v27, %v954_v26  ;;  %v1643_v26 = vmov 2475754826  }
  0x9b   : > { %v962_v29 = vrot.slane %v961_v28, 4 }
  0x9d   : > { %v963_v30 = vadd.f32 %v962_v29, %v961_v28  ;;  %v1644_v28 = vmov 2131351028  }
  0x9f   : > { %v964_v31 = vrot.slane %v963_v30, 2  ;;  %v1061_v45 = vpop.permute.xlu0 %1060 }
  0xa1   : > { %v965_v32 = vadd.f32 %v964_v31, %v963_v30  ;;  %v1645_v30 = vmov 2102212464  }
  0xa3   : > { %v966_v34 = vrot.slane %v965_v32, 1 }
  0xa5   : > { %v967_v35 = vadd.f32 %v966_v34, %v965_v32  ;;  %v1646_v32 = vmov 920167782  }
  0xf0   : > { %v1446_v37 = vpop.f32.mrb[0].mxu0  ;;  %v1454_v38 = vpop.f32.mrb[0].mxu1 }
  0xf1   : > { %v1835_v39 = vadd.f32 %v1446_v37, %v399_v25  ;;  %v1048_v40 = vadd.f32 %v1454_v38, %v967_v35  ;;  %v490_v41 = vpop.f32.mrb[1].mxu0  ;;  %v1042_v42 = vpop.f32.mrb[1].mxu1 }
  0xf2   : > { %v1837_v43 = vadd.f32 %v490_v41, %v394_v24  ;;  %v1043_v44 = vadd.f32 %v1042_v42, %v967_v35 }
  0xf3   : > { %v613_v46 = vand.u32 2147483647, %v1835_v39  ;;  %v616_v47 = vand.u32 2139095040, %v1835_v39  ;;  %v1064_v49 = vadd.f32 %v1061_v45, %v1048_v40  ;;  %v1647_v40 = vmov 1326507024  }
  0xf4   : > { %v509_v50 = vand.u32 2147483647, %v1837_v43  ;;  %v512_v51 = vand.u32 2139095040, %v1837_v43  ;;  %v1449_v52 = vpop.f32.mrb[2].mxu0  ;;  %v1063_v55 = vadd.f32 %v1056_v48, %v1043_v44  ;;  %vm511_vm15 = vcmp.lt.s32.totalorder %v1837_v43, 0 }
  0xf5   : > { %v617_v53 = vshrl.u32 %v616_v47, 23  ;;  %v620_v54 = vand.u32 8388607, %v613_v46  ;;  %v1845_v56 = vadd.f32 %v1449_v52, %v409_v36  ;;  %v500_v57 = vpop.f32.mrb[3].mxu0  ;;  %v1067_v61 = vmul.f32 1.442695, %v1064_v49 }
  0xf6   : > { %v513_v58 = vshrl.u32 %v512_v51, 23  ;;  %v516_v60 = vand.u32 8388607, %v509_v50  ;;  %v1065_v3 = vmul.f32 1.442695, %v1063_v55  ;;  %v1857_v9 = vadd.f32 %v500_v57, %v404_v33 }
  0xf7   : > { %v1403_v59 = vadd.s32 4294967169, %v617_v53  ;;  %v821_v63 = vand.u32 2147483647, %v1845_v56  ;;  %v621_v1 = vor.u32 8388608, %v620_v54  ;;  %v824_v7 = vand.u32 2139095040, %v1845_v56 }
  0xf8   : > { %v1399_v62 = vadd.s32 4294967169, %v513_v58  ;;  %v1850_v0 = vpop.f32.mrb[4].mxu0  ;;  %v517_v5 = vor.u32 8388608, %v516_v60  ;;  %1554 = vpow2.f32 %v1067_v61 }
  0xf9   : > { %v623_v2 = vadd.s32 1, %v1403_v59  ;;  %v1466_v4 = vpop.f32.mrb[5].mxu0  ;;  %v1855_v8 = vand.u32 8388607, %v821_v63  ;;  %v825_v11 = vshrl.u32 %v824_v7, 23  ;;  %v1859_v15 = vshll.u32 %v621_v1, 8 }
  0xfa   : > { %v519_v6 = vadd.s32 1, %v1399_v62  ;;  %v1863_v18 = vshll.u32 %v517_v5, 8  ;;  %1556 = vpow2.f32 %v1065_v3 }
  0xfb   : > { %vm624_vm2 = vcmp.gt.s32.totalorder %v623_v2, 0  ;;  %v829_v19 = vor.u32 8388608, %v1855_v8  ;;  %v1867_v25 = vadd.s32 4294967169, %v825_v11 }
  0xfc   : > { %v625_v10 = vsel %vm624_vm2, %v623_v2, 0  ;;  %vm520_vm3 = vcmp.gt.s32.totalorder %v519_v6, 0 }
  0xfd   : > { %v626_v13 = vshrl.u32 %v625_v10, 5  ;;  %v627_v14 = vand.u32 31, %v625_v10  ;;  %v521_v16 = vsel %vm520_vm3, %v519_v6, 0 }
  0xfe   : > { %v1861_v17 = vshrl.u32 %v521_v16, 5  ;;  %v523_v24 = vand.u32 31, %v521_v16 }
  0xff   : > { %v628_v20 = vsub.s32 32, %v627_v14  ;;  %v630_v22 = vshll.u32 %v1642_v21, %v627_v14  ;;  %v633_v27 = vshll.u32 %v1643_v26, %v627_v14  ;;  %v636_v29 = vshll.u32 %v1644_v28, %v627_v14 }
 0x100   : > { %v639_v31 = vshll.u32 %v1645_v30, %v627_v14  ;;  %v642_v33 = vshll.u32 %v1646_v32, %v627_v14  ;;  %vm645_vm4 = vcmp.lt.s32.totalorder %v626_v13, 1  ;;  %vm646_vm5 = vcmp.lt.s32.totalorder %v626_v13, 2 }
 0x101   : > { %v631_v34 = vshrl.u32 %v1643_v26, %v628_v20  ;;  %v634_v35 = vshrl.u32 %v1644_v28, %v628_v20  ;;  %v637_v36 = vshrl.u32 %v1645_v30, %v628_v20  ;;  %v629_v37 = vshrl.u32 %v1642_v21, %v628_v20 }
 0x102   : > { %v640_v38 = vshrl.u32 %v1646_v32, %v628_v20  ;;  %v643_v41 = vshrl.u32 %v1647_v40, %v628_v20  ;;  %v524_v47 = vsub.s32 32, %v523_v24  ;;  %vm647_vm6 = vcmp.lt.s32.totalorder %v626_v13, 3  ;;  %v1882_v55 = vpop.eup %1554 }
 0x103   : > { %v632_v42 = vor.u32 %v631_v34, %v630_v22  ;;  %v635_v44 = vor.u32 %v634_v35, %v633_v27  ;;  %v638_v45 = vor.u32 %v637_v36, %v636_v29  ;;  %vm648_vm7 = vcmp.lt.s32.totalorder %v626_v13, 4 }
 0x104   : > { %v641_v48 = vor.u32 %v640_v38, %v639_v31  ;;  %v644_v49 = vor.u32 %v643_v41, %v642_v33  ;;  %v526_v60 = vshll.u32 %v1642_v21, %v523_v24  ;;  %v527_v1 = vshrl.u32 %v1643_v26, %v524_v47  ;;  %v1887_v3 = vpop.eup %1556 }
 0x105   : > { %v649_v51 = vsel %vm645_vm4, %v629_v37, %v632_v42  ;;  %v650_v52 = vsel %vm648_vm7, %v638_v45, 2102212464  ;;  %v653_v53 = vsel %vm645_vm4, %v632_v42, %v635_v44  ;;  %v657_v54 = vsel %vm645_vm4, %v635_v44, %v638_v45 }
 0x106   : > { %v651_v57 = vsel %vm647_vm6, %v635_v44, %v650_v52  ;;  %v654_v58 = vsel %vm648_vm7, %v641_v48, 920167782  ;;  %v658_v59 = vsel %vm648_vm7, %v644_v49, 1326507024  ;;  %v529_v2 = vshll.u32 %v1643_v26, %v523_v24 }
 0x107   : > { %v655_v61 = vsel %vm647_vm6, %v638_v45, %v654_v58  ;;  %v659_v62 = vsel %vm647_vm6, %v641_v48, %v658_v59  ;;  %v652_v4 = vsel %vm646_vm5, %v649_v51, %v651_v57  ;;  %v530_v7 = vshrl.u32 %v1644_v28, %v524_v47 }
 0x108   : > { %v656_v5 = vsel %vm646_vm5, %v653_v53, %v655_v61  ;;  %v660_v6 = vsel %vm646_vm5, %v657_v54, %v659_v62  ;;  %v528_v20 = vor.u32 %v527_v1, %v526_v60  ;;  %v532_v27 = vshll.u32 %v1644_v28, %v523_v24 }
 0x109   : > { %v1894_v10 = vmul.u32.u64.low %v1859_v15, %v660_v6  ;;  %v1895_v11 = vmul.u32.u64.high %v1859_v15, %v660_v6, %v1894_v10  ;;  %v1898_v14 = vmul.u32.u64.low %v1859_v15, %v656_v5  ;;  %v1899_v16 = vmul.u32.u64.high %v1859_v15, %v656_v5, %v1898_v14 }
 0x10a   : > { %v531_v22 = vor.u32 %v530_v7, %v529_v2  ;;  %v533_v29 = vshrl.u32 %v1645_v30, %v524_v47  ;;  %v525_v31 = vshrl.u32 %v1642_v21, %v524_v47  ;;  %v535_v13 = vshll.u32 %v1645_v30, %v523_v24 }
 0x10b   : > { %v536_v33 = vshrl.u32 %v1646_v32, %v524_v47  ;;  %v539_v34 = vshrl.u32 %v1647_v40, %v524_v47  ;;  %v668_v35 = vmul.u32 %v1859_v15, %v652_v4  ;;  %v538_v37 = vshll.u32 %v1646_v32, %v523_v24 }
 0x10c   : > { %v534_v36 = vor.u32 %v533_v29, %v532_v27  ;;  %vm541_vm8 = vcmp.lt.s32.totalorder %v1861_v17, 1  ;;  %vm670_vm9 = vc.u32 %v1895_v11, %v1898_v14  ;;  %v671_v38 = vadd.s32 1, %v1899_v16  ;;  %v1074_v29 = vpop.permute.xlu1 %1073 }
 0x10d   : > { %v537_v41 = vor.u32 %v536_v33, %v535_v13  ;;  %vm542_vm10 = vcmp.lt.s32.totalorder %v1861_v17, 2  ;;  %v540_v42 = vor.u32 %v539_v34, %v538_v37  ;;  %vm543_vm11 = vcmp.lt.s32.totalorder %v1861_v17, 3 }
 0x10e   : > { %vm544_vm12 = vcmp.lt.s32.totalorder %v1861_v17, 4  ;;  %v549_v44 = vsel %vm541_vm8, %v528_v20, %v531_v22  ;;  %v672_v15 = vsel %vm670_vm9, %v671_v38, %v1899_v16  ;;  %v553_v24 = vsel %vm541_vm8, %v531_v22, %v534_v36 }
 0x10f   : > { %v546_v45 = vsel %vm544_vm12, %v534_v36, 2102212464  ;;  %v550_v47 = vsel %vm544_vm12, %v537_v41, 920167782  ;;  %v673_v48 = vadd.s32 %v672_v15, %v668_v35  ;;  %v545_v49 = vsel %vm541_vm8, %v525_v31, %v528_v20 }
 0x110   : > { %v551_v51 = vsel %vm543_vm11, %v534_v36, %v550_v47  ;;  %v554_v52 = vsel %vm544_vm12, %v540_v42, 1326507024  ;;  %v547_v53 = vsel %vm543_vm11, %v531_v22, %v546_v45  ;;  %v831_v58 = vadd.s32 1, %v1867_v25 }
 0x111   : > { %v552_v54 = vsel %vm542_vm10, %v549_v44, %v551_v51  ;;  %v555_v57 = vsel %vm543_vm11, %v537_v41, %v554_v52  ;;  %v674_v59 = vadd.s32 536870912, %v673_v48  ;;  %v548_v5 = vsel %vm542_vm10, %v545_v49, %v547_v53 }
 0x112   : > { %v556_v60 = vsel %vm542_vm10, %v553_v24, %v555_v57  ;;  %v1922_v61 = vmul.u32.u64.low %v1863_v18, %v552_v54  ;;  %v1923_v62 = vmul.u32.u64.high %v1863_v18, %v552_v54, %v1922_v61  ;;  %vm832_vm13 = vcmp.gt.s32.totalorder %v831_v58, 0 }
 0x113   : > { %v1927_v1 = vmul.u32.u64.low %v1863_v18, %v556_v60  ;;  %v1928_v2 = vmul.u32.u64.high %v1863_v18, %v556_v60, %v1927_v1  ;;  %v1930_v4 = vshrl.u32 %v674_v59, 30  ;;  %v833_v25 = vsel %vm832_vm13, %v831_v58, 0 }
 0x114   : > { %v717_v6 = vand.u32 2147483647, %v1857_v9  ;;  %v835_v7 = vand.u32 31, %v833_v25  ;;  %v567_v16 = vadd.s32 1, %v1923_v62  ;;  %v1939_v20 = vshll.u32 %v829_v19, 8  ;;  %v1079_v19 = vpop.permute.xlu0 %1078 }
 0x115   : > { %v676_v10 = vshll.u32 %v1930_v4, 30  ;;  %v1942_v22 = vadd.s32 %v1898_v14, %v1895_v11  ;;  %v564_v27 = vmul.u32 %v1863_v18, %v548_v5  ;;  %vm566_vm14 = vc.u32 %v1928_v2, %v1922_v61 }
 0x116   : > { %v836_v17 = vsub.s32 32, %v835_v7  ;;  %v568_v13 = vsel %vm566_vm14, %v567_v16, %v1923_v62  ;;  %v720_v33 = vand.u32 2139095040, %v1857_v9  ;;  %v1953_v8 = vand.u32 8388607, %v717_v6 }
 0x117   : > { %v1947_v31 = vsub.s32 %v673_v48, %v676_v10  ;;  %v569_v11 = vadd.s32 %v568_v13, %v564_v27  ;;  %v1955_v14 = vshrl.u32 %v833_v25, 5  ;;  %v1959_v34 = vmul.f32 %v1887_v3, %v1074_v29 }
 0x118   : > { %v839_v18 = vshrl.u32 %v1643_v26, %v836_v17  ;;  %v838_v36 = vshll.u32 %v1642_v21, %v835_v7  ;;  %v842_v37 = vshrl.u32 %v1644_v28, %v836_v17  ;;  %v1965_v38 = vmul.f32 %v1882_v55, %v1079_v19 }
 0x119   : > { %v679_v35 = vsub.s32 0, %v1947_v31  ;;  %v570_v41 = vadd.s32 536870912, %v569_v11  ;;  %v841_v42 = vshll.u32 %v1643_v26, %v835_v7  ;;  %v844_v44 = vshll.u32 %v1644_v28, %v835_v7 }
 0x11a   : > { %v845_v15 = vshrl.u32 %v1645_v30, %v836_v17  ;;  %v840_v45 = vor.u32 %v839_v18, %v838_v36  ;;  %v847_v47 = vshll.u32 %v1645_v30, %v835_v7  ;;  %v848_v24 = vshrl.u32 %v1646_v32, %v836_v17 }
 0x11b   : > { %v1404_v3 = vmin.u32 %v679_v35, %v1947_v31  ;;  %v571_v48 = vshrl.u32 %v570_v41, 30  ;;  %v843_v49 = vor.u32 %v842_v37, %v841_v42  ;;  %v851_v51 = vshrl.u32 %v1647_v40, %v836_v17 }
 0x11c   : > { %v846_v55 = vor.u32 %v845_v15, %v844_v44  ;;  %v699_v53 = vsub.s32 4, %v1930_v4  ;;  %v849_v54 = vor.u32 %v848_v24, %v847_v47  ;;  %v850_v57 = vshll.u32 %v1646_v32, %v835_v7 }
 0x11d   : > { %v681_v52 = vclz %v1404_v3  ;;  %v572_v58 = vshll.u32 %v571_v48, 30  ;;  %v595_v59 = vsub.s32 4, %v571_v48  ;;  %v837_v60 = vshrl.u32 %v1642_v21, %v836_v17 }
 0x11e   : > { %vm853_vm0 = vcmp.lt.s32.totalorder %v1955_v14, 1  ;;  %v852_v1 = vor.u32 %v851_v51, %v850_v57  ;;  %vm855_vm2 = vcmp.lt.s32.totalorder %v1955_v14, 3  ;;  %vm856_vm3 = vcmp.lt.s32.totalorder %v1955_v14, 4 }
 0x11f   : > { %v1405_v62 = vadd.s32 4294967294, %v681_v52  ;;  %vm615_vm4 = vcmp.lt.s32.totalorder %v1835_v39, 0  ;;  %vm1984_vm5 = vcmp.le.f32.partialorder %v509_v50, 0.7853982  ;;  %v1988_v25 = vsub.s32 %v569_v11, %v572_v58 }
 0x120   : > { %v858_v7 = vsel %vm856_vm3, %v846_v55, 2102212464  ;;  %v861_v10 = vsel %vm853_vm0, %v840_v45, %v843_v49  ;;  %v862_v16 = vsel %vm856_vm3, %v849_v54, 920167782  ;;  %v857_v27 = vsel %vm853_vm0, %v837_v60, %v840_v45 }
 0x121   : > { %vm1406_vm6 = vcmp.lt.s32.totalorder %v1405_v62, 0  ;;  %v859_v50 = vsel %vm855_vm2, %v843_v49, %v858_v7  ;;  %v863_v17 = vsel %vm855_vm2, %v846_v55, %v862_v16  ;;  %v575_v13 = vsub.s32 0, %v1988_v25  ;;  %v1090_v7 = vld [vmem:[%s2228_s8] sm:$0xff] }
 0x122   : > { %v684_v29 = vsel %vm1406_vm6, 0, %v1405_v62  ;;  %vm854_vm7 = vcmp.lt.s32.totalorder %v1955_v14, 2  ;;  %v721_v19 = vshrl.u32 %v720_v33, 23  ;;  %vm1091_vm8 = vcmask 130048  }
 0x123   : > { %vm2006_vm9 = vcmp.le.f32.partialorder %v613_v46, 0.7853982  ;;  %v685_v18 = vsub.s32 32, %v684_v29  ;;  %v689_v35 = vsub.s32 4294967266, %v684_v29  ;;  %v596_v36 = vsel %vm511_vm15, %v595_v59, %v571_v48 }
 0x124   : > { %v864_v37 = vsel %vm854_vm7, %v861_v10, %v863_v17  ;;  %v1400_v41 = vmin.u32 %v575_v13, %v1988_v25  ;;  %v860_v33 = vsel %vm854_vm7, %v857_v27, %v859_v50  ;;  %v865_v42 = vsel %vm853_vm0, %v843_v49, %v846_v55 }
 0x125   : > { %v866_v46 = vsel %vm856_vm3, %v852_v1, 1326507024  ;;  %v686_v44 = vshll.u32 %v1947_v31, %v684_v29  ;;  %v687_v15 = vshrl.u32 %v1942_v22, %v685_v18  ;;  %v690_v3 = vadd.s32 127, %v689_v35 }
 0x126   : > { %v867_v45 = vsel %vm855_vm2, %v849_v54, %v866_v46  ;;  %v577_v47 = vclz %v1400_v41  ;;  %v2028_v48 = vmul.u32.u64.low %v1939_v20, %v864_v37  ;;  %v2029_v51 = vmul.u32.u64.high %v1939_v20, %v864_v37, %v2028_v48 }
 0x127   : > { %v868_v24 = vsel %vm854_vm7, %v865_v42, %v867_v45  ;;  %v688_v49 = vor.u32 %v687_v15, %v686_v44  ;;  %v691_v55 = vshll.u32 %v690_v3, 23  ;;  %v565_v22 = vadd.s32 %v1922_v61, %v1928_v2 }
 0x128   : > { %v2033_v52 = vmul.u32.u64.low %v1939_v20, %v868_v24  ;;  %v2034_v31 = vmul.u32.u64.high %v1939_v20, %v868_v24, %v2033_v52  ;;  %v1401_v57 = vadd.s32 4294967294, %v577_v47  ;;  %v1407_v54 = vadd.s32 4294967169, %v721_v19 }
 0x129   : > { %v1479_v14 = vpack.c.bf16 %v1965_v38, %v1959_v34  ;;  %v692_v58 = vor.u32 4788187, %v691_v55  ;;  %v700_v59 = vsel %vm615_vm4, %v699_v53, %v1930_v4  ;;  %v598_v60 = vsel %vm1984_vm5, 0, %v596_v36 }
 0x12a   : > { %v2047_v62 = vadd.f32 %v1965_v38, %v1959_v34  ;;  %vm1402_vm10 = vcmp.lt.s32.totalorder %v1401_v57, 0  ;;  %v876_v61 = vmul.u32 %v1939_v20, %v860_v33  ;;  %v879_v2 = vadd.s32 1, %v2029_v51 }
 0x12b   : > { %v727_v1 = vadd.s32 1, %v1407_v54  ;;  %1480 = vmatpush3.bf16.msra.mxu1 %v1479_v14  ;;  %v693_v10 = vand.u32 2147483647, %v692_v58  ;;  %v695_v4 = vcvt.s32.f32 %v688_v49  ;;  %v580_v53 = vsel %vm1402_vm10, 0, %v1401_v57 }
 0x12c   : > { %vm878_vm11 = vc.u32 %v2034_v31, %v2028_v48  ;;  %1481 = vmatprep.subr.bf16.mxu1 %v1641_v23  ;;  %v702_v34 = vsel %vm2006_vm9, 0, %v700_v59  ;;  %v581_v20 = vsub.s32 32, %v580_v53  ;;  %v585_v38 = vsub.s32 4294967266, %v580_v53 }
 0x12d   : > { %v880_v16 = vsel %vm878_vm11, %v879_v2, %v2029_v51  ;;  %v696_v27 = vmul.f32 %v695_v4, %v693_v10  ;;  %v602_v50 = vadd.s32 3, %v598_v60  ;;  %vm728_vm12 = vcmp.gt.s32.totalorder %v727_v1, 0 }
 0x12e   : > { %v881_v17 = vadd.s32 %v880_v16, %v876_v61  ;;  %1460 = vmatmul.mubr.msk.f32.vlgmr.msra.gmra.mrb[2].mxu1 %vm1091_vm8, %v1090_v7  ;;  %v582_v29 = vshll.u32 %v1988_v25, %v580_v53  ;;  %v583_v13 = vshrl.u32 %v565_v22, %v581_v20  ;;  %v586_v19 = vadd.s32 127, %v585_v38 }
 0x12f   : > { %v729_v18 = vsel %vm728_vm12, %v727_v1, 0  ;;  %1475 = vmatprep.mubr.msk.f32.mxu1 %vm1640_vm1, %v1639_v12  ;;  %v697_v35 = vxor.u32 2147483648, %v696_v27  ;;  %v2064_v41 = vadd.s32 3, %v702_v34  ;;  %v2068_v44 = vand.u32 3, %v602_v50 }
 0x130   : > { %v882_v36 = vadd.s32 536870912, %v881_v17  ;;  %v731_v37 = vand.u32 31, %v729_v18  ;;  %v584_v33 = vor.u32 %v583_v13, %v582_v29  ;;  %v587_v42 = vshll.u32 %v586_v19, 23 }
 0x131   : > { %v698_v46 = vsel %vm615_vm4, %v697_v35, %v696_v27  ;;  %v725_v45 = vor.u32 8388608, %v1953_v8  ;;  %v1084_v47 = vrot.slane %v2047_v62, 4  ;;  %v730_v49 = vshrl.u32 %v729_v18, 5 }
 0x132   : > { %v2070_v15 = vshrl.u32 %v882_v36, 30  ;;  %v732_v25 = vsub.s32 32, %v731_v37  ;;  %v701_v3 = vsel %vm2006_vm9, %v1835_v39, %v698_v46  ;;  %v588_v12 = vor.u32 4788187, %v587_v42 }
 0x133   : > { %v591_v24 = vcvt.s32.f32 %v584_v33  ;;  %v734_v55 = vshll.u32 %v1642_v21, %v731_v37  ;;  %v737_v57 = vshll.u32 %v1643_v26, %v731_v37  ;;  %1558 = vcosq.f32 %v701_v3 }
 0x134   : > { %v884_v51 = vshll.u32 %v2070_v15, 30  ;;  %v589_v52 = vand.u32 2147483647, %v588_v12  ;;  %v735_v22 = vshrl.u32 %v1643_v26, %v732_v25  ;;  %v738_v54 = vshrl.u32 %v1644_v28, %v732_v25 }
 0x135   : > { %v740_v8 = vshll.u32 %v1644_v28, %v731_v37  ;;  %v741_v14 = vshrl.u32 %v1645_v30, %v732_v25  ;;  %1560 = vsinq.f32 %v701_v3  ;;  %v2086_v60 = vshll.u32 %v725_v45, 8 }
 0x136   : > { %v2082_v11 = vsub.s32 %v881_v17, %v884_v51  ;;  %v592_v58 = vmul.f32 %v591_v24, %v589_v52  ;;  %v736_v59 = vor.u32 %v735_v22, %v734_v55  ;;  %v739_v2 = vor.u32 %v738_v54, %v737_v57 }
 0x137   : > { %v742_v1 = vor.u32 %v741_v14, %v740_v8  ;;  %v743_v26 = vshll.u32 %v1645_v30, %v731_v37  ;;  %v744_v10 = vshrl.u32 %v1646_v32, %v732_v25  ;;  %v746_v4 = vshll.u32 %v1646_v32, %v731_v37 }
 0x138   : > { %v887_v61 = vsub.s32 0, %v2082_v11  ;;  %v593_v7 = vxor.u32 2147483648, %v592_v58  ;;  %v747_v28 = vshrl.u32 %v1647_v40, %v732_v25  ;;  %v733_v34 = vshrl.u32 %v1642_v21, %v732_v25 }
 0x139   : > { %vm749_vm1 = vcmp.lt.s32.totalorder %v730_v49, 1  ;;  %v1085_v20 = vadd.f32 %v1084_v47, %v2047_v62  ;;  %v745_v16 = vor.u32 %v744_v10, %v743_v26  ;;  %vm750_vm13 = vcmp.lt.s32.totalorder %v730_v49, 2 }
 0x13a   : > { %v1412_v53 = vmin.u32 %v887_v61, %v2082_v11  ;;  %v594_v38 = vsel %vm511_vm15, %v593_v7, %v592_v58  ;;  %v748_v27 = vor.u32 %v747_v28, %v746_v4  ;;  %vm751_vm14 = vcmp.lt.s32.totalorder %v730_v49, 3 }
 0x13b   : > { %v597_v30 = vsel %vm1984_vm5, %v1837_v43, %v594_v38  ;;  %vm752_vm0 = vcmp.lt.s32.totalorder %v730_v49, 4  ;;  %v757_v21 = vsel %vm749_vm1, %v736_v59, %v739_v2  ;;  %v753_v17 = vsel %vm749_vm1, %v733_v34, %v736_v59 }
 0x13c   : > { %v889_v32 = vclz %v1412_v53  ;;  %1562 = vcosq.f32 %v597_v30  ;;  %v754_v40 = vsel %vm752_vm0, %v742_v1, 2102212464  ;;  %v758_v50 = vsel %vm752_vm0, %v745_v16, 920167782 }
 0x13d   : > { %1564 = vsinq.f32 %v597_v30  ;;  %v759_v29 = vsel %vm751_vm14, %v742_v1, %v758_v50  ;;  %v755_v13 = vsel %vm751_vm14, %v739_v2, %v754_v40  ;;  %v761_v5 = vsel %vm749_vm1, %v739_v2, %v742_v1  ;;  %v1559_v35 = vpop.eup %1558 }
 0x13e   : > { %v1413_v62 = vadd.s32 4294967294, %v889_v32  ;;  %v760_v19 = vsel %vm750_vm13, %v757_v21, %v759_v29  ;;  %v762_v18 = vsel %vm752_vm0, %v748_v27, 1326507024  ;;  %v1086_v3 = vrot.slane %v1085_v20, 2 }
 0x13f   : > { %v763_v36 = vsel %vm751_vm14, %v745_v16, %v762_v18  ;;  %v2109_v37 = vmul.u32.u64.low %v2086_v60, %v760_v19  ;;  %v2110_v33 = vmul.u32.u64.high %v2086_v60, %v760_v19, %v2109_v37  ;;  %v1561_v42 = vpop.eup %1560  ;;  %v707_v12 = vand.u32 3, %v2064_v41 }
 0x140   : > { %vm1414_vm15 = vcmp.lt.s32.totalorder %v1413_v62, 0  ;;  %v764_v25 = vsel %vm750_vm13, %v761_v5, %v763_v36  ;;  %v756_v24 = vsel %vm750_vm13, %v753_v17, %v755_v13  ;;  %v1087_v52 = vadd.f32 %v1086_v3, %v1085_v20  ;;  %v937_v20 = vpop.permute.xlu0 %936 }
 0x141   : > { %v892_v46 = vsel %vm1414_vm15, 0, %v1413_v62  ;;  %v2117_v51 = vmul.u32.u64.low %v2086_v60, %v764_v25  ;;  %v2118_v55 = vmul.u32.u64.high %v2086_v60, %v764_v25, %v2117_v51  ;;  %v877_v22 = vadd.s32 %v2028_v48, %v2034_v31 }
 0x142   : > { %v893_v45 = vsub.s32 32, %v892_v46  ;;  %v897_v47 = vsub.s32 4294967266, %v892_v46  ;;  %v775_v54 = vadd.s32 1, %v2110_v33  ;;  %vm604_vm2 = vcmp.lt.s32.totalorder %v2068_v44, 2 }
 0x143   : > { %v772_v8 = vmul.u32 %v2086_v60, %v756_v24  ;;  %v1088_v41 = vrot.slane %v1087_v52, 1  ;;  %vm605_vm3 = vcmp.eq.s32.totalorder %v2068_v44, 0  ;;  %v710_v49 = vxor.u32 2147483648, %v1561_v42 }
 0x144   : > { %v898_v57 = vadd.s32 127, %v897_v47  ;;  %v895_v14 = vshrl.u32 %v877_v22, %v893_v45  ;;  %vm608_vm4 = vcmp.eq.s32.totalorder %v2068_v44, 2  ;;  %vm709_vm5 = vcmp.eq.s32.totalorder %v707_v12, 0 }
 0x145   : > { %v713_v58 = vxor.u32 2147483648, %v1559_v35  ;;  %vm774_vm6 = vc.u32 %v2118_v55, %v2109_v37  ;;  %v1089_v48 = vadd.f32 %v1088_v41, %v1087_v52  ;;  %v711_v31 = vsel %vm709_vm5, %v1559_v35, %v710_v49 }
 0x146   : > { %v1563_v59 = vpop.eup %1562  ;;  %v899_v61 = vshll.u32 %v898_v57, 23  ;;  %v776_v1 = vsel %vm774_vm6, %v775_v54, %v2110_v33  ;;  %vm708_vm7 = vcmp.lt.s32.totalorder %v707_v12, 2  ;;  %vm712_vm8 = vcmp.eq.s32.totalorder %v707_v12, 2 }
 0x147   : > { %v1565_v2 = vpop.eup %1564  ;;  %v609_v60 = vxor.u32 2147483648, %v1563_v59  ;;  %v777_v26 = vadd.s32 %v776_v1, %v772_v8  ;;  %v2131_v7 = vmul.f32 %v1850_v0, %v1089_v48  ;;  %v714_v4 = vsel %vm712_vm8, %v713_v58, %v1561_v42 }
 0x148   : > { %v606_v10 = vxor.u32 2147483648, %v1565_v2  ;;  %v894_v28 = vshll.u32 %v2082_v11, %v892_v46  ;;  %vm705_vm9 = vweird.f32 %v1835_v39  ;;  %v715_v34 = vsel %vm708_vm7, %v711_v31, %v714_v4  ;;  %v932_v11 = vpop.permute.xlu1 %931 }
 0x149   : > { %v610_v53 = vsel %vm608_vm4, %v609_v60, %v1565_v2  ;;  %v900_v38 = vor.u32 4788187, %v899_v61  ;;  %v778_v16 = vadd.s32 536870912, %v777_v26  ;;  %v716_v30 = vsel %vm705_vm9, nan, %v715_v34 }
 0x14a   : > { %v607_v27 = vsel %vm605_vm3, %v1563_v59, %v606_v10  ;;  %vm601_vm10 = vweird.f32 %v1837_v43  ;;  %v950_v32 = vmul.f32 %v937_v20, %v716_v30  ;;  %v896_v40 = vor.u32 %v895_v14, %v894_v28  ;;  %v947_v30 = vpop.permute.xlu0 %946 }
 0x14b   : > { %v611_v0 = vsel %vm604_vm2, %v607_v27, %v610_v53  ;;  %v779_v21 = vshrl.u32 %v778_v16, 30  ;;  %v901_v39 = vand.u32 2147483647, %v900_v38  ;;  %vm823_vm11 = vcmp.lt.s32.totalorder %v1845_v56, 0 }
 0x14c   : > { %v612_v50 = vsel %vm601_vm10, nan, %v611_v0  ;;  %v903_v13 = vcvt.s32.f32 %v896_v40  ;;  %vm2148_vm1 = vcmp.le.f32.partialorder %v821_v63, 0.7853982  ;;  %v907_v51 = vsub.s32 4, %v2070_v15  ;;  %v942_v40 = vpop.permute.xlu1 %941 }
 0x14d   : > { %v949_v62 = vmul.f32 %v932_v11, %v612_v50  ;;  %v780_v17 = vshll.u32 %v779_v21, 30  ;;  %v803_v41 = vsub.s32 4, %v779_v21  ;;  %vm719_vm13 = vcmp.lt.s32.totalorder %v1857_v9, 0 }
 0x14e   : > { %v904_v5 = vmul.f32 %v903_v13, %v901_v39  ;;  %vm718_vm14 = vcmp.le.f32.partialorder %v717_v6, 0.7853982  ;;  %vm913_vm3 = vweird.f32 %v1845_v56  ;;  %vm809_vm7 = vweird.f32 %v1857_v9 }
 0x14f   : > { %v1482_v29 = vpack.c.bf16 %v950_v32, %v949_v62  ;;  %v781_v19 = vsub.s32 %v777_v26, %v780_v17  ;;  %v804_v61 = vsel %vm719_vm13, %v803_v41, %v779_v21  ;;  %vm1241_vm8 = vcmask 261120  }
 0x150   : > { %v905_v35 = vxor.u32 2147483648, %v904_v5  ;;  %v806_v2 = vsel %vm718_vm14, 0, %v804_v61 }
 0x151   : > { %1483 = vmatpush3.bf16.msra.mxu1 %v1482_v29  ;;  %v783_v18 = vsub.s32 0, %v781_v19  ;;  %v810_v26 = vadd.s32 3, %v806_v2 }
 0x152   : > { %1484 = vmatprep.subr.bf16.mxu1 %v1641_v23  ;;  %v906_v33 = vsel %vm823_vm11, %v905_v35, %v904_v5  ;;  %v773_v23 = vadd.s32 %v2109_v37, %v2118_v55  ;;  %v908_v37 = vsel %vm823_vm11, %v907_v51, %v2070_v15 }
 0x153   : > { %v1408_v43 = vmin.u32 %v783_v18, %v781_v19  ;;  %v909_v12 = vsel %vm2148_vm1, %v1845_v56, %v906_v33  ;;  %v910_v54 = vsel %vm2148_vm1, 0, %v908_v37  ;;  %v811_v28 = vand.u32 3, %v810_v26  ;;  %v953_v56 = vld [vmem:[%s2224_s4] sm:$0xff] }
 0x154   : > { %1566 = vcosq.f32 %v909_v12  ;;  %v914_v14 = vadd.s32 3, %v910_v54 }
 0x155   : > { %v785_v44 = vclz %v1408_v43  ;;  %1568 = vsinq.f32 %v909_v12  ;;  %vm816_vm4 = vcmp.eq.s32.totalorder %v811_v28, 2  ;;  %vm813_vm5 = vcmp.eq.s32.totalorder %v811_v28, 0 }
 0x156   : > { %v915_v31 = vand.u32 3, %v914_v14  ;;  %vm812_vm6 = vcmp.lt.s32.totalorder %v811_v28, 2 }
 0x157   : > { %v1409_v36 = vadd.s32 4294967294, %v785_v44 }
 0x158   : > { %vm917_vm0 = vcmp.eq.s32.totalorder %v915_v31, 0  ;;  %vm920_vm15 = vcmp.eq.s32.totalorder %v915_v31, 2  ;;  %vm916_vm2 = vcmp.lt.s32.totalorder %v915_v31, 2 }
 0x159   : > { %vm1410_vm12 = vcmp.lt.s32.totalorder %v1409_v36, 0 }
 0x15a   : > { %v788_v42 = vsel %vm1410_vm12, 0, %v1409_v36 }
 0x15b   : > { %v789_v25 = vsub.s32 32, %v788_v42  ;;  %v793_v3 = vsub.s32 4294967266, %v788_v42  ;;  %v790_v45 = vshll.u32 %v781_v19, %v788_v42 }
 0x15d   : > { %v791_v47 = vshrl.u32 %v773_v23, %v789_v25  ;;  %v794_v24 = vadd.s32 127, %v793_v3 }
 0x15e   : > { %v1567_v58 = vpop.eup %1566 }
 0x15f   : > { %v792_v52 = vor.u32 %v791_v47, %v790_v45  ;;  %v795_v63 = vshll.u32 %v794_v24, 23  ;;  %v1569_v48 = vpop.eup %1568  ;;  %v921_v60 = vxor.u32 2147483648, %v1567_v58 }
 0x160   : > { %v918_v1 = vxor.u32 2147483648, %v1569_v48 }
 0x161   : > { %v796_v22 = vor.u32 4788187, %v795_v63  ;;  %v799_v57 = vcvt.s32.f32 %v792_v52  ;;  %v922_v4 = vsel %vm920_vm15, %v921_v60, %v1569_v48 }
 0x162   : > { %v919_v10 = vsel %vm917_vm0, %v1567_v58, %v918_v1 }
 0x163   : > { %v797_v55 = vand.u32 2147483647, %v796_v22  ;;  %v923_v53 = vsel %vm916_vm2, %v919_v10, %v922_v4 }
 0x164   : > { %v924_v16 = vsel %vm913_vm3, nan, %v923_v53 }
 0x165   : > { %v800_v8 = vmul.f32 %v799_v57, %v797_v55  ;;  %v952_v11 = vmul.f32 %v947_v30, %v924_v16 }
 0x167   : > { %v801_v49 = vxor.u32 2147483648, %v800_v8 }
 0x169   : > { %v802_v59 = vsel %vm719_vm13, %v801_v49, %v800_v8 }
 0x16a   : > { %v805_v15 = vsel %vm718_vm14, %v1857_v9, %v802_v59 }
 0x16b   : > { %1570 = vcosq.f32 %v805_v15 }
 0x16c   : > { %1572 = vsinq.f32 %v805_v15 }
 0x175   : > { %v1571_v6 = vpop.eup %1570 }
 0x176   : > { %v1573_v34 = vpop.eup %1572  ;;  %v817_v20 = vxor.u32 2147483648, %v1571_v6 }
 0x177   : > { %v814_v38 = vxor.u32 2147483648, %v1573_v34 }
 0x178   : > { %v818_v27 = vsel %vm816_vm4, %v817_v20, %v1573_v34 }
 0x179   : > { %v815_v0 = vsel %vm813_vm5, %v1571_v6, %v814_v38 }
 0x17a   : > { %v819_v32 = vsel %vm812_vm6, %v815_v0, %v818_v27 }
 0x17b   : > { %v820_v21 = vsel %vm809_vm7, nan, %v819_v32 }
 0x17c   : > { %v951_v50 = vmul.f32 %v942_v40, %v820_v21 }
 0x17e   : > { %v1485_v62 = vpack.c.bf16 %v952_v11, %v951_v50 }
 0x180   : > { %1486 = vmatpush3.bf16.msra.mxu1 %v1485_v62 }
 0x183   : > { %1476 = vmatmul.mubr.msk.f32.vlgmr.msra.gmra.mrb[4].mxu1 %vm1241_vm8, %v953_v56 }
 0x201   : > { %v1161_v39 = vpop.f32.mrb[2].mxu1 }
 0x202   : > { %v1240_v17 = vsub.f32 %v1161_v39, %v2131_v7  ;;  %v1461_v29 = vpop.f32.mrb[3].mxu1 }
 0x256   : > { %v1311_v9 = vpop.f32.mrb[4].mxu1 }
 0x257   : > { %v1312_v13 = vadd.f32 %v1311_v9, %v1240_v17  ;;  %v1477_v19 = vpop.f32.mrb[5].mxu1 }
 0x259   : > { %1315 = vst [vmem:[%s377_s15] sm:$0xff] %v1312_v13 }
 0x25a   : > { %1587 = shalt.err (!%p1584_p3)
}
 0x25b   : > { %s1588_s30 = scalar_lea.hbm %s2178_s24, 128  ;;  %s1592_s15 = scalar_lea.hbm %s2231_s11, 256 }
 0x25c   : > { %p1589_p4 = scmp.ne.s32.totalorder %s2178_s24, %s1588_s30  ;;  %p1593_p9 = scmp.lt.u32.totalorder %s2178_s24, %s2231_s11 }
 0x25d   : > { %p1594_p10 = scmp.lt.u32.totalorder %s1592_s15, %s1588_s30  ;;  %p1596_p12 = scmp.lt.u32.totalorder %s1588_s30, %s2178_s24 }
 0x25e   : > { %p1590_p7 = pnand %p1589_p4, %p1747_p5 }
 0x25f   : > { %p1595_p11 = por %p1594_p10, %p1593_p9 }
 0x260   : > { %p1591_p8 = pneg %p1590_p7 }
 0x261   : > { %p1597_p13 = por %p1596_p12, %p1595_p11 }
 0x263   : > { %p1598_p0 = pnand %p1597_p13, %p1591_p8 }
 0x265   : > { %1601 = shalt.err (!%p1598_p0)
}
 0x266   : > { %1503 = dma.vmem_to_hbm [thread:$0]  (%p1747_p5), %s2180_s16, 128, %s2178_s24, %s1317_s26  }
 0x267 PF: > { %p1509_p1 = scmp.ge.s32.totalorder %s1636_s20, 2  ;;  %s1342_s25 = sand.u32 1, %s1624_s17  }
 0x268   : > { %s1343_s21 = scalar_lea.sflag [#allocation3], %s1342_s25 }
 0x269   : > { %p1506_p2 = pnand %p1509_p1, %p1751_p6 }
 0x26b   : > { %1619 = dma.done.wait (!%p1506_p2), %s1343_s21, 128  }
 0x26c   : > { %1621 = vsyncadd (!%p1506_p2), %s1343_s21, 4294967168  ;;  %s2243_s19 = sld [smem:[#allocation5_spill]]  ;;  %s2244_s29 = sld [smem:[#allocation6_spill]] }
 0x26d   : > { %p21_p3 = scmp.ge.s32.totalorder %s1734_s23, 4   ;;  %s2245_s17 = smov %s1628_s18 }
 0x26e   : > { %s2248_s20 = smov %s1734_s23 }
 0x26f   :  { %23 = sbr.rel (!%p21_p3) target bundleno = 3 (0x3), region = 99 }
 0x272   : > { %s2246_s18 = smov %s2243_s19  ;;  %s2247_s19 = smov %s2244_s29 }
 0x276   :  { %1348 = vsyncpa [#allocation3], 1 }
 0x277   :  { %1350 = vsyncpa [#allocation3 + $0x1], 1 }

</bundles_post_ra>
